<compile_context>
chip_gen: v6e
topology: v6e:2x2x1
jax: 0.10.0
libtpu: 0.0.40
codegen_flags: <defaults>
</compile_context>

<pallas_src>
import jax
import jax.numpy as jnp
from jax.experimental import pallas as pl
from jax.experimental.pallas import tpu as pltpu


def self_attn_kernel(joint_ref, delta_ref, traj_ref, wq_ref, wk_ref, wv_ref, out_ref):
    nb, m, e = joint_ref.shape
    o = wq_ref.shape[1]

    # Q/K/V projections: fold (Nb, M) into one wide (Nb*M, E) @ (E, O) MXU matmul each.
    # Leading-dim collapse is a layout no-op when M % 8 == 0.
    x2 = joint_ref[...].reshape(nb * m, e)                           # (Nb*M, E) bf16

    def proj(w_ref):
        y = jnp.dot(x2, w_ref[...], preferred_element_type=jnp.float32)   # f32 accumulate
        return y.astype(jnp.bfloat16).reshape(nb, m, o)              # (Nb, M, O) bf16

    q = proj(wq_ref)
    k = proj(wk_ref)
    v = proj(wv_ref)

    # scores[b, i, j] = <q[b, i, :], k[b, j, :]>  (== Q @ K^T), then + delta.
    # TODO(synk): for large M, inspect MLIR for a vxpose on K and emit K pre-transposed if so.
    scores = jnp.einsum('bmo,bno->bmn', q, k,
                        preferred_element_type=jnp.float32)          # (Nb, M, M) f32
    scores = scores + delta_ref[...].astype(jnp.float32).reshape(nb, m, m)

    # Numerically-stable softmax over the last axis, divide on the EUP slot.
    mx = jnp.max(scores, axis=-1, keepdims=True)
    ex = jnp.exp(scores - mx)
    denom = jnp.sum(ex, axis=-1, keepdims=True)
    p = ex * pl.reciprocal(denom, approx=True)                       # (Nb, M, M) f32

    # traj_len mask applied AFTER softmax (matches the PyTorch module), fully vectorized.
    t = traj_ref[...]                                                # (Nb, 1, 1) int32
    row = jax.lax.broadcasted_iota(jnp.int32, (nb, m, m), 1)
    col = jax.lax.broadcasted_iota(jnp.int32, (nb, m, m), 2)
    valid = (row < t) & (col < t)
    p = p * valid.astype(p.dtype)

    # attn_out = attn @ V, stored lane-dense as (Nb, M*O).
    out = jnp.einsum('bmn,bno->bmo', p.astype(jnp.bfloat16), v,
                     preferred_element_type=jnp.float32)             # (Nb, M, O) f32
    out_ref[...] = out.reshape(nb, m * o).astype(out_ref.dtype)


def _vmem_required(nb, M, E, O):
    """VMEM bytes: double-buffered pipelined blocks + weights + in-kernel f32 temporaries."""
    joint_blk = nb * M * E * 2            # bf16
    delta_blk = nb * M * M * 2            # bf16
    out_blk = nb * M * O * 4              # f32
    traj_blk = nb * 8 * 128 * 4           # (1,1) minor tiles pad to (8,128) int32
    weights = 2 * 3 * E * O * 2           # 3 bf16 weight blocks, double-buffered
    # TODO(synk): single-buffer the grid-invariant weights via pipeline_mode=pl.Buffered(1)
    # once buffer_count=1 is reliably supported; counted as double-buffered here.
    temps = 3 * nb * M * O * 4 + 4 * nb * M * M * 4   # q/k/v + scores/ex/p/mask
    return 2 * (joint_blk + delta_blk + out_blk + traj_blk) + weights + temps


def _pick_block_n(N, M, E, O, budget_bytes):
    """Largest batch block that fits the VMEM budget.  Nb must be N itself or a multiple
    of 8 so the flattened (Nb, M*M)/(Nb, M*O) blocks satisfy the (8,128) sublane rule.
    No forced >=2 grid steps: the grid is a serial loop on single-TC v5e/v6e."""
    candidates = [d for d in range(1, N + 1) if N % d == 0 and (d == N or d % 8 == 0)]
    fitting = [d for d in candidates if _vmem_required(d, M, E, O) <= budget_bytes]
    return max(fitting) if fitting else min(candidates)


def self_attn_forward(joint, delta, traj_len, wq, wk, wv, *,
                      block_n=None, vmem_budget_bytes=36 * 1024 * 1024):
    N, M, E = joint.shape
    O = wq.shape[0]
    assert delta.shape[:3] == (N, M, M)
    assert wq.shape == wk.shape == wv.shape == (O, E)
    # Best performance when M % 8 == 0 (the in-kernel reshapes become layout no-ops).

    # torch.sum(delta, -1) done in the wrapper; ship it lane-dense (N, M*M) and in bf16
    # (halves the kernel's largest HBM read; upcast to f32 inside before adding to scores).
    delta_sum = jnp.sum(delta, axis=-1).astype(jnp.bfloat16).reshape(N, M * M)

    # traj_len as a tiny (N,1,1) int32 VMEM input -> vectorized in-kernel mask.
    traj3 = traj_len.astype(jnp.int32).reshape(N, 1, 1)

    # bf16 MXU feeds; weights pre-transposed once to (E, O).
    joint_b = joint.astype(jnp.bfloat16)
    wq_t = wq.T.astype(jnp.bfloat16)
    wk_t = wk.T.astype(jnp.bfloat16)
    wv_t = wv.T.astype(jnp.bfloat16)

    Nb = block_n if block_n is not None else _pick_block_n(N, M, E, O, vmem_budget_bytes)
    assert N % Nb == 0 and (Nb == N or Nb % 8 == 0)
    req = _vmem_required(Nb, M, E, O)

    # Explicit scoped-VMEM limit: cover the real requirement with headroom, but stay well
    # under v7x's 64 MiB per-TC physical VMEM (also raises v5e's 16 MiB default).
    vmem_limit = int(min(max(2 * req, 32 * 1024 * 1024), 56 * 1024 * 1024))
    vmem_limit = int(max(vmem_limit, req + (4 << 20)))

    out_flat = pl.pallas_call(
        self_attn_kernel,
        out_shape=jax.ShapeDtypeStruct((N, M * O), jnp.float32),
        grid_spec=pltpu.PrefetchScalarGridSpec(
            num_scalar_prefetch=0,
            grid=(N // Nb,),
            in_specs=[
                pl.BlockSpec((Nb, M, E), lambda n: (n, 0, 0)),      # joint (bf16)
                pl.BlockSpec((Nb, M * M), lambda n: (n, 0)),        # delta_sum, lane-dense (bf16)
                pl.BlockSpec((Nb, 1, 1), lambda n: (n, 0, 0)),      # traj_len (int32)
                pl.BlockSpec((E, O), lambda n: (0, 0)),             # Wq^T (bf16, grid-invariant)
                pl.BlockSpec((E, O), lambda n: (0, 0)),             # Wk^T
                pl.BlockSpec((E, O), lambda n: (0, 0)),             # Wv^T
            ],
            out_specs=pl.BlockSpec((Nb, M * O), lambda n: (n, 0)),  # lane-dense output
        ),
        compiler_params=pltpu.CompilerParams(
            dimension_semantics=("parallel",),
            vmem_limit_bytes=vmem_limit),
    )(joint_b, delta_sum, traj3, wq_t, wk_t, wv_t)

    return out_flat.reshape(N, M, O)


def self_attn_reference(joint, delta, traj_len, wq, wk, wv):
    d = jnp.sum(delta, -1)                                          # (N, M, M)
    N, M, _ = d.shape
    idx = jnp.arange(M)
    valid = idx[None, :] < traj_len[:, None]                        # (N, M)
    mask = (valid[:, :, None] & valid[:, None, :]).astype(jnp.float32)
    q = jnp.einsum('nme,oe->nmo', joint, wq)
    k = jnp.einsum('nme,oe->nmo', joint, wk)
    v = jnp.einsum('nme,oe->nmo', joint, wv)
    attn = jnp.einsum('nmo,nlo->nml', q, k) + d
    attn = jax.nn.softmax(attn, axis=-1) * mask
    return jnp.einsum('nml,nlo->nmo', attn, v)


if __name__ == "__main__":
    # Small, forward-consistent shapes.
    N = 4       # batch
    M = 8       # max sequence length (padded trajectory length)
    E = 32      # emb_size
    O = 32      # output_size
    D = 4       # trailing delta-feature axis (summed away)

    key = jax.random.PRNGKey(0)
    k1, k2, k3, k4, k5, k6 = jax.random.split(key, 6)

    # Linear(emb_size, output_size, bias=False) weights.
    wq = jax.random.normal(k1, (O, E), dtype=jnp.float32) * 0.1
    wk = jax.random.normal(k2, (O, E), dtype=jnp.float32) * 0.1
    wv = jax.random.normal(k3, (O, E), dtype=jnp.float32) * 0.1

    # Inputs.
    joint = jax.random.normal(k4, (N, M, E), dtype=jnp.float32)
    delta = jax.random.normal(k5, (N, M, M, D), dtype=jnp.float32) * 0.1
    traj_len = jax.random.randint(k6, (N,), 1, M + 1, dtype=jnp.int32)

    out = self_attn_forward(joint, delta, traj_len, wq, wk, wv)
    out = jax.block_until_ready(out)

    ref = self_attn_reference(joint, delta, traj_len, wq, wk, wv)
    assert out.shape == (N, M, O)
    # bf16 MXU inputs + approx reciprocal -> compare against the f32 reference with a
    # correspondingly relaxed tolerance.
    max_err = float(jnp.max(jnp.abs(out - ref)))
    assert jnp.allclose(out, ref, atol=5e-2, rtol=5e-2), f"max abs err = {max_err}"

    print("KERNEL_OK")
</pallas_src>

<mosaic_0001>
module attributes {stable_mosaic.version = 11 : i64} {
  func.func @self_attn_kernel(%arg0: i32, %arg1: memref<4x8x32xbf16, #tpu.memory_space<vmem>>, %arg2: memref<4x64xbf16, #tpu.memory_space<vmem>>, %arg3: memref<4x1x1xi32, #tpu.memory_space<vmem>>, %arg4: memref<32x32xbf16, #tpu.memory_space<vmem>>, %arg5: memref<32x32xbf16, #tpu.memory_space<vmem>>, %arg6: memref<32x32xbf16, #tpu.memory_space<vmem>>, %arg7: memref<4x256xf32, #tpu.memory_space<vmem>>) attributes {dimension_semantics = [#tpu.dimension_semantics<parallel>], iteration_bounds = array<i64: 1>, scalar_prefetch = 0 : i64, scratch_operands = 0 : i64, tpu.core_type = #tpu.core_type<tc>, window_params = [{transform_indices = @transform_0, window_bounds = array<i64: 4, 8, 32>}, {transform_indices = @transform_1, window_bounds = array<i64: 4, 64>}, {transform_indices = @transform_2, window_bounds = array<i64: 4, 1, 1>}, {pipeline_mode = #tpu.pipeline_mode<synchronous>, transform_indices = @transform_3, window_bounds = array<i64: 32, 32>}, {pipeline_mode = #tpu.pipeline_mode<synchronous>, transform_indices = @transform_4, window_bounds = array<i64: 32, 32>}, {pipeline_mode = #tpu.pipeline_mode<synchronous>, transform_indices = @transform_5, window_bounds = array<i64: 32, 32>}, {transform_indices = @transform_6, window_bounds = array<i64: 4, 256>}]} {
    %c0 = arith.constant 0 : index
    %c0_0 = arith.constant 0 : index
    %c0_1 = arith.constant 0 : index
    %0 = vector.load %arg1[%c0, %c0_0, %c0_1] : memref<4x8x32xbf16, #tpu.memory_space<vmem>>, vector<4x8x32xbf16>
    %1 = vector.shape_cast %0 : vector<4x8x32xbf16> to vector<32x32xbf16>
    %c0_2 = arith.constant 0 : index
    %c0_3 = arith.constant 0 : index
    %2 = vector.load %arg4[%c0_2, %c0_3] : memref<32x32xbf16, #tpu.memory_space<vmem>>, vector<32x32xbf16>
    %cst = arith.constant dense<0.000000e+00> : vector<32x32xf32>
    %3 = tpu.matmul %1, %2, %cst {dimension_numbers = #tpu.dot_dimension_numbers<[1], [0], [0], [1], [0, 0, 1, 1], [], []>} : vector<32x32xbf16>, vector<32x32xbf16>, vector<32x32xf32> -> vector<32x32xf32>
    %4 = arith.truncf %3 : vector<32x32xf32> to vector<32x32xbf16>
    %5 = vector.shape_cast %4 : vector<32x32xbf16> to vector<4x8x32xbf16>
    %c0_4 = arith.constant 0 : index
    %c0_5 = arith.constant 0 : index
    %6 = vector.load %arg5[%c0_4, %c0_5] : memref<32x32xbf16, #tpu.memory_space<vmem>>, vector<32x32xbf16>
    %cst_6 = arith.constant dense<0.000000e+00> : vector<32x32xf32>
    %7 = tpu.matmul %1, %6, %cst_6 {dimension_numbers = #tpu.dot_dimension_numbers<[1], [0], [0], [1], [0, 0, 1, 1], [], []>} : vector<32x32xbf16>, vector<32x32xbf16>, vector<32x32xf32> -> vector<32x32xf32>
    %8 = arith.truncf %7 : vector<32x32xf32> to vector<32x32xbf16>
    %9 = vector.shape_cast %8 : vector<32x32xbf16> to vector<4x8x32xbf16>
    %c0_7 = arith.constant 0 : index
    %c0_8 = arith.constant 0 : index
    %10 = vector.load %arg6[%c0_7, %c0_8] : memref<32x32xbf16, #tpu.memory_space<vmem>>, vector<32x32xbf16>
    %cst_9 = arith.constant dense<0.000000e+00> : vector<32x32xf32>
    %11 = tpu.matmul %1, %10, %cst_9 {dimension_numbers = #tpu.dot_dimension_numbers<[1], [0], [0], [1], [0, 0, 1, 1], [], []>} : vector<32x32xbf16>, vector<32x32xbf16>, vector<32x32xf32> -> vector<32x32xf32>
    %12 = arith.truncf %11 : vector<32x32xf32> to vector<32x32xbf16>
    %13 = vector.shape_cast %12 : vector<32x32xbf16> to vector<4x8x32xbf16>
    "tpu.trace_start"() <{level = 10 : i32, message = "bmo,bno->bmn"}> : () -> ()
    %cst_10 = arith.constant dense<0.000000e+00> : vector<4x8x8xf32>
    %14 = tpu.matmul %5, %9, %cst_10 {dimension_numbers = #tpu.dot_dimension_numbers<[2], [2], [1], [1], [0, 0, 0, 1, 1, 1], [0], [0]>} : vector<4x8x32xbf16>, vector<4x8x32xbf16>, vector<4x8x8xf32> -> vector<4x8x8xf32>
    "tpu.trace_stop"() : () -> ()
    %c0_11 = arith.constant 0 : index
    %c0_12 = arith.constant 0 : index
    %15 = vector.load %arg2[%c0_11, %c0_12] : memref<4x64xbf16, #tpu.memory_space<vmem>>, vector<4x64xbf16>
    %16 = arith.extf %15 : vector<4x64xbf16> to vector<4x64xf32>
    %17 = vector.shape_cast %16 : vector<4x64xf32> to vector<4x8x8xf32>
    %18 = arith.addf %14, %17 : vector<4x8x8xf32>
    %cst_13 = arith.constant dense<0xFF800000> : vector<4x8xf32>
    %19 = vector.multi_reduction <maximumf>, %18, %cst_13 [2] : vector<4x8x8xf32> to vector<4x8xf32>
    %20 = vector.shape_cast %19 : vector<4x8xf32> to vector<4x8x1xf32>
    %21 = vector.broadcast %20 : vector<4x8x1xf32> to vector<4x8x8xf32>
    %22 = arith.subf %18, %21 : vector<4x8x8xf32>
    %23 = math.exp %22 : vector<4x8x8xf32>
    %cst_14 = arith.constant dense<0.000000e+00> : vector<4x8xf32>
    %24 = vector.multi_reduction <add>, %23, %cst_14 [2] : vector<4x8x8xf32> to vector<4x8xf32>
    %25 = vector.shape_cast %24 : vector<4x8xf32> to vector<4x8x1xf32>
    %26 = tpu.reciprocal %25 {approx = true} : vector<4x8x1xf32> -> vector<4x8x1xf32>
    %27 = vector.broadcast %26 : vector<4x8x1xf32> to vector<4x8x8xf32>
    %28 = arith.mulf %23, %27 : vector<4x8x8xf32>
    %c0_15 = arith.constant 0 : index
    %c0_16 = arith.constant 0 : index
    %c0_17 = arith.constant 0 : index
    %29 = vector.load %arg3[%c0_15, %c0_16, %c0_17] : memref<4x1x1xi32, #tpu.memory_space<vmem>>, vector<4x1x1xi32>
    %30 = tpu.iota {dimensions = array<i32: 1>} : vector<4x8x8xi32>
    %31 = tpu.iota {dimensions = array<i32: 2>} : vector<4x8x8xi32>
    %32 = vector.broadcast %29 : vector<4x1x1xi32> to vector<4x8x8xi32>
    %33 = arith.cmpi slt, %30, %32 : vector<4x8x8xi32>
    %34 = vector.broadcast %29 : vector<4x1x1xi32> to vector<4x8x8xi32>
    %35 = arith.cmpi slt, %31, %34 : vector<4x8x8xi32>
    %36 = arith.andi %33, %35 : vector<4x8x8xi1>
    %37 = arith.extui %36 : vector<4x8x8xi1> to vector<4x8x8xi32>
    %38 = arith.sitofp %37 : vector<4x8x8xi32> to vector<4x8x8xf32>
    %39 = arith.mulf %28, %38 : vector<4x8x8xf32>
    %40 = arith.truncf %39 : vector<4x8x8xf32> to vector<4x8x8xbf16>
    "tpu.trace_start"() <{level = 10 : i32, message = "bmn,bno->bmo"}> : () -> ()
    %cst_18 = arith.constant dense<0.000000e+00> : vector<4x8x32xf32>
    %41 = tpu.matmul %40, %13, %cst_18 {dimension_numbers = #tpu.dot_dimension_numbers<[2], [1], [1], [2], [0, 0, 0, 1, 1, 2], [0], [0]>} : vector<4x8x8xbf16>, vector<4x8x32xbf16>, vector<4x8x32xf32> -> vector<4x8x32xf32>
    "tpu.trace_stop"() : () -> ()
    %42 = vector.shape_cast %41 : vector<4x8x32xf32> to vector<4x256xf32>
    %c0_19 = arith.constant 0 : index
    %c0_20 = arith.constant 0 : index
    %43 = vector.load %arg7[%c0_19, %c0_20] : memref<4x256xf32, #tpu.memory_space<vmem>>, vector<4x256xf32>
    tpu.vector_store %arg7[%c0_19, %c0_20], %42 {strides = array<i32>} : memref<4x256xf32, #tpu.memory_space<vmem>>, vector<4x256xf32>,
    return
  }
  func.func @transform_0(%arg0: i32) -> (i32, i32, i32) {
    %c0_i32 = arith.constant 0 : i32
    %c0_i32_0 = arith.constant 0 : i32
    %c0_i32_1 = arith.constant 0 : i32
    return %arg0, %c0_i32, %c0_i32_0 : i32, i32, i32
  }
  func.func @transform_1(%arg0: i32) -> (i32, i32) {
    %c0_i32 = arith.constant 0 : i32
    %c0_i32_0 = arith.constant 0 : i32
    return %arg0, %c0_i32 : i32, i32
  }
  func.func @transform_2(%arg0: i32) -> (i32, i32, i32) {
    %c0_i32 = arith.constant 0 : i32
    %c0_i32_0 = arith.constant 0 : i32
    %c0_i32_1 = arith.constant 0 : i32
    return %arg0, %c0_i32, %c0_i32_0 : i32, i32, i32
  }
  func.func @transform_3(%arg0: i32) -> (i32, i32) {
    %c0_i32 = arith.constant 0 : i32
    %c0_i32_0 = arith.constant 0 : i32
    %c0_i32_1 = arith.constant 0 : i32
    return %c0_i32, %c0_i32_0 : i32, i32
  }
  func.func @transform_4(%arg0: i32) -> (i32, i32) {
    %c0_i32 = arith.constant 0 : i32
    %c0_i32_0 = arith.constant 0 : i32
    %c0_i32_1 = arith.constant 0 : i32
    return %c0_i32, %c0_i32_0 : i32, i32
  }
  func.func @transform_5(%arg0: i32) -> (i32, i32) {
    %c0_i32 = arith.constant 0 : i32
    %c0_i32_0 = arith.constant 0 : i32
    %c0_i32_1 = arith.constant 0 : i32
    return %c0_i32, %c0_i32_0 : i32, i32
  }
  func.func @transform_6(%arg0: i32) -> (i32, i32) {
    %c0_i32 = arith.constant 0 : i32
    %c0_i32_0 = arith.constant 0 : i32
    return %arg0, %c0_i32 : i32, i32
  }
}

</mosaic_0001>

<bundles_post_ra>
// kernel: tpu_custom_call.1
= control target key start
LH: loop header
LB: loop body
LE: loop exit
PB: predicated region body
PF: predicated region fallthrough
CT: control target
= control target key end

     0   :  { %11 = vsyncpa [#allocation3], 0  ;;  %s1558_s0 = inlined_call_operand.hbm [shape: bf16[4,8,32], index: 0, kind: input, shape index: {}]   ;;  %s1559_s1 = inlined_call_operand.vmem [shape: bf16[4,64], index: 1, kind: input, shape index: {}]   ;;  %s1560_s2 = inlined_call_operand.vmem [shape: s32[4,1,1], index: 2, kind: input, shape index: {}]   ;;  %s1561_s3 = inlined_call_operand.hbm [shape: bf16[32,32], index: 3, kind: input, shape index: {}]   ;;  %s1562_s4 = inlined_call_operand.hbm [shape: bf16[32,32], index: 4, kind: input, shape index: {}]   ;;  %s1563_s5 = inlined_call_operand.hbm [shape: bf16[32,32], index: 5, kind: input, shape index: {}]   ;;  %s1564_s6 = inlined_call_operand.hbm [shape: f32[4,256], index: 6, kind: output, shape index: {}]  }
   0x1   :  { %12 = vsyncpa [#allocation6], 0 }
   0x2   :  { %13 = vsyncpa [#allocation9], 0 }
   0x3   :  { %14 = vsyncpa [#allocation4], 0  ;;  %s1350_s21 = smov [#allocation5]   ;;  %s1351_s23 = smov [#allocation2]  }
   0x4   :  { %s36_s22 = sshll.u32 %s1350_s21, 4  ;;  %s20_s24 = sshll.u32 %s1351_s23, 4  ;;  %s37_s22 = int_to_ptr.vmem [resolvable:$true] %s36_s22  ;;  %s21_s24 = int_to_ptr.vmem [resolvable:$true] %s20_s24 }
   0x5   :  { %s1250_s25 = scalar_lea.vmem %s37_s22, 256  ;;  %p1255_p1 = scmp.lt.s32.totalorder %s37_s22, %s37_s22 }
   0x6   :  { %p1251_p0 = scmp.ne.s32.totalorder %s37_s22, %s1250_s25  ;;  %p1256_p2 = scmp.lt.s32.totalorder %s1250_s25, %s1250_s25 }
   0x8   :  { %p1257_p3 = por %p1256_p2, %p1255_p1 }
   0xa   :  { %p1258_p4 = pnand %p1257_p3, %p1251_p0 }
   0xc   :  { %1261 = shalt.err (!%p1258_p4)
}
   0xd   :  { %s1352_s26 = smov 64   ;;  %s1353_s27 = smov 4  }
   0xe   :  { %42 = dma.hbm_to_vmem [thread:$0]  %s1561_s3, 256, %s37_s22, [#allocation6], %s1352_s26, %s1352_s26, %s1353_s27  }
   0xf   :  { %s1270_s30 = scalar_lea.vmem %s21_s24, 256  ;;  %p1275_p6 = scmp.lt.s32.totalorder %s21_s24, %s21_s24 }
  0x10   :  { %p1271_p5 = scmp.ne.s32.totalorder %s21_s24, %s1270_s30  ;;  %p1276_p7 = scmp.lt.s32.totalorder %s1270_s30, %s1270_s30 }
  0x12   :  { %p1277_p8 = por %p1276_p7, %p1275_p6 }
  0x14   :  { %p1278_p9 = pnand %p1277_p8, %p1271_p5 }
  0x16   :  { %1281 = shalt.err (!%p1278_p9)
}
  0x17   :  { %26 = dma.hbm_to_vmem [thread:$0]  %s1558_s0, 256, %s21_s24, [#allocation3], %s1352_s26, %s1352_s26, %s1353_s27  }
  0x18   :  { %s1354_s9 = smov [#allocation7]   ;;  %s1355_s11 = smov [#allocation8]  }
  0x19   :  { %s48_s10 = sshll.u32 %s1354_s9, 4  ;;  %s60_s12 = sshll.u32 %s1355_s11, 4  ;;  %s49_s10 = int_to_ptr.vmem [resolvable:$true] %s48_s10  ;;  %s61_s12 = int_to_ptr.vmem [resolvable:$true] %s60_s12 }
  0x1a   :  { %s1290_s3 = scalar_lea.vmem %s49_s10, 256  ;;  %p1295_p11 = scmp.lt.s32.totalorder %s49_s10, %s49_s10 }
  0x1b   :  { %p1291_p10 = scmp.ne.s32.totalorder %s49_s10, %s1290_s3  ;;  %p1296_p12 = scmp.lt.s32.totalorder %s1290_s3, %s1290_s3 }
  0x1d   :  { %p1297_p13 = por %p1296_p12, %p1295_p11 }
  0x1f   :  { %p1298_p0 = pnand %p1297_p13, %p1291_p10 }
  0x21   :  { %1301 = shalt.err (!%p1298_p0)
}
  0x22   :  { %54 = dma.hbm_to_vmem [thread:$0]  %s1562_s4, 256, %s49_s10, [#allocation6], %s1352_s26, %s1352_s26, %s1353_s27  }
  0x23   :  { %s1310_s0 = scalar_lea.vmem %s61_s12, 256  ;;  %p1315_p2 = scmp.lt.s32.totalorder %s61_s12, %s61_s12 }
  0x24   :  { %p1311_p1 = scmp.ne.s32.totalorder %s61_s12, %s1310_s0  ;;  %p1316_p3 = scmp.lt.s32.totalorder %s1310_s0, %s1310_s0 }
  0x26   :  { %p1317_p4 = por %p1316_p3, %p1315_p2 }
  0x28   :  { %p1318_p5 = pnand %p1317_p4, %p1311_p1 }
  0x2a   :  { %1321 = shalt.err (!%p1318_p5)
}
  0x2b   :  { %66 = dma.hbm_to_vmem [thread:$0]  %s1563_s5, 256, %s61_s12, [#allocation9], %s1352_s26, %s1352_s26, %s1353_s27  }
  0x2c   :  { %1342 = dma.done.wait [#allocation3], 256  }
  0x2d   :  { %1343 = vsyncadd [#allocation3], 4294967040 }
  0x2e   :  { %1344 = dma.done.wait [#allocation6], 512  }
  0x2f   :  { %1345 = vsyncadd [#allocation6], 4294966784 }
  0x30   :  { %1346 = dma.done.wait [#allocation9], 256  }
  0x31   :  { %1347 = vsyncadd [#allocation9], 4294967040  ;;  %v1218_v0 = vld [vmem:[#allocation7 + $0x8] sm:$0xff]   ;;  %v1219_v1 = vld [vmem:[#allocation5 + $0x8] sm:$0xff]   ;;  %vm110_vm0 = vcmask 261120   ;;  %v1356_v8 = vmov 0.0   ;;  %v360_v48 = vlaneseq }
  0x32   :  { %1132 = vmatprep.subr.bf16.mxu1 %v1218_v0  ;;  %v1220_v2 = vld [vmem:[#allocation7] sm:$0xff]   ;;  %1124 = vmatprep.subr.bf16.mxu0 %v1219_v1  ;;  %v1221_v3 = vld [vmem:[#allocation5] sm:$0xff]   ;;  %v1223_v5 = vld [vmem:[#allocation2 + $0x8] sm:$0xff]   ;;  %vm1357_vm1 = vmmov 0   ;;  %s1358_s17 = smov 120   ;;  %s1359_s18 = smov 104  }
  0x33   :  { %1133 = vmatpush3.bf16.msra.mxu1 %v1218_v0  ;;  %1125 = vmatpush3.bf16.msra.mxu0 %v1219_v1  ;;  %v1222_v4 = vld [vmem:[#allocation2] sm:$0xff]   ;;  %v1224_v6 = vld [vmem:[#allocation8 + $0x8] sm:$0xff]   ;;  %v1225_v7 = vld [vmem:[#allocation8] sm:$0xff]   ;;  %s1360_s19 = smov 112   ;;  %s1361_s20 = smov 96   ;;  %vm736_vm2 = vcmask 1043456  }
  0x34   :  { %1134 = vmatprep.subr.bf16.mxu1 %v1220_v2  ;;  %1126 = vmatprep.subr.bf16.mxu0 %v1221_v3  ;;  %v332_v9 = vld [vmem:[%s1559_s1] sm:$0x3]  ;;  %s1362_s21 = smov 88   ;;  %s1363_s22 = smov 80   ;;  %v1365_v46 = vmov 1983009808  }
  0x35   :  { %1136 = vmatprep.mubr.msk.bf16.mxu1 %vm110_vm0, %v1222_v4  ;;  %1128 = vmatprep.mubr.msk.bf16.mxu0 %vm110_vm0, %v1222_v4  ;;  %v1444_v10 = vunpack.c.l.bf16 %v332_v9  ;;  %s1364_s1 = smov 72   ;;  %v358_v47 = vunpack.c.l.s4 %v1365_v46  ;;  %v1481_v52 = vshrl.u32 %v360_v48, 7  ;;  %v1366_v56 = vmov 1934713408  }
  0x36   :  { %v375_v57 = vunpack.c.l.s4 %v1366_v56  ;;  %vm624_vm3 = vcmask 64512  }
  0x37   :  { %1135 = vmatpush3.bf16.msra.mxu1 %v1220_v2  ;;  %1127 = vmatpush3.bf16.msra.mxu0 %v1221_v3  ;;  %v359_v51 = vunpack.c.0.s8 %v358_v47 }
  0x38   :  { %1140 = vmatprep.subr.bf16.mxu0 %v1224_v6  ;;  %1148 = vmatprep.subr.bf16.mxu1 %v1356_v8  ;;  %v376_v62 = vunpack.c.0.s8 %v375_v57 }
  0x39   :  { %335 = vrot.lane.b32.xlu0 %v1444_v10, %s1358_s17  ;;  %341 = vrot.lane.b32.xlu1 %v1444_v10, %s1359_s18  ;;  %v1484_v55 = vsub.s32 %v359_v51, %v1481_v52 }
  0x3a   :  { %1137 = vmatmul.mubr.msk.bf16.vlgmr.msra.gmra.mxu1 %vm110_vm0, %v1223_v5  ;;  %1129 = vmatmul.mubr.msk.bf16.vlgmr.msra.gmra.mxu0 %vm110_vm0, %v1223_v5 }
  0x3b   :  { %1141 = vmatpush3.bf16.msra.mxu0 %v1224_v6  ;;  %1144 = vmatprep.mubr.msk.bf16.mxu0 %vm110_vm0, %v1222_v4 }
  0x3c   :  { %1142 = vmatprep.subr.bf16.mxu0 %v1225_v7  ;;  %1150 = vmatprep.mubr.msk.bf16.mxu1 %vm1357_vm1, %v1356_v8 }
  0x3d   :  { %338 = vrot.lane.b32.xlu0 %v1444_v10, %s1360_s19  ;;  %344 = vrot.lane.b32.xlu1 %v1444_v10, %s1361_s20 }
  0x3f   :  { %1143 = vmatpush3.bf16.msra.mxu0 %v1225_v7 }
  0x40   :  { %1154 = vmatprep.subr.bf16.mxu0 %v1356_v8 }
  0x41   :  { %347 = vrot.lane.b32.xlu0 %v1444_v10, %s1362_s21  ;;  %350 = vrot.lane.b32.xlu1 %v1444_v10, %s1363_s22 }
  0x42   :  { %1145 = vmatmul.mubr.msk.bf16.vlgmr.msra.gmra.mxu0 %vm110_vm0, %v1223_v5  ;;  %v1492_v5 = vsub.s32 %v376_v62, %v1481_v52  ;;  %v1073_v62 = vld [vmem:[%s1560_s2 + $0x1] ss:$0 sm:$0xff] }
  0x43   :  { %1156 = vmatprep.mubr.msk.bf16.mxu0 %vm1357_vm1, %v1356_v8 }
  0x45   :  { %353 = vrot.lane.b32.xlu0 %v1444_v10, %s1364_s1 }
  0xab   :  { %v336_v43 = vpop.permute.xlu0 %335  ;;  %v342_v44 = vpop.permute.xlu1 %341 }
  0xac   :  { %v364_v58 = vcombine.low %v336_v43, %v342_v44  ;;  %v1367_v43 = vmov 0  }
  0xad   :  { %1217 = vset.pattern.permute.xlu1 %v1367_v43  ;;  %1216 = vset.pattern.permute.xlu0 %v1367_v43 }
  0xae   :  { %v371_v63 = vrot.slane %v364_v58, %v1484_v55 }
  0xaf   :  { %v339_v45 = vpop.permute.xlu0 %338  ;;  %v345_v49 = vpop.permute.xlu1 %344 }
  0xb0   :  { %v356_v59 = vcombine.low %v1444_v10, %v339_v45 }
  0xb2   :  { %v363_v0 = vrot.slane %v356_v59, %v1484_v55 }
  0xb3   :  { %v348_v50 = vpop.permute.xlu0 %347  ;;  %v351_v53 = vpop.permute.xlu1 %350 }
  0xb4   :  { %v390_v60 = vcombine.low %v345_v49, %v351_v53  ;;  %v372_v3 = vcombine.low %v363_v0, %v371_v63  ;;  %v373_v9 = vcombine.high %v363_v0, %v371_v63  ;;  %v1074_v63 = vld [vmem:[%s1560_s2 + $0x2] ss:$0 sm:$0xff]  ;;  %v1072_v0 = vld [vmem:[%s1560_s2] ss:$0 sm:$0xff] }
  0xb6   :  { %v397_v1 = vrot.slane %v390_v60, %v1484_v55  ;;  %v380_v6 = vrot.slane %v372_v3, %v1492_v5 }
  0xb7   :  { %v354_v54 = vpop.permute.xlu0 %353 }
  0xb8   :  { %v398_v61 = vcombine.low %v348_v50, %v354_v54 }
  0xba   :  { %v405_v2 = vrot.slane %v398_v61, %v1484_v55 }
  0xbc   :  { %v406_v4 = vcombine.low %v397_v1, %v405_v2  ;;  %v407_v10 = vcombine.high %v397_v1, %v405_v2 }
  0xbe   :  { %v414_v7 = vrot.slane %v406_v4, %v1492_v5 }
  0xfa   :  { %v1138_v11 = vpop.f32.mrf.mxu1  ;;  %v1130_v12 = vpop.f32.mrf.mxu0 }
  0xfb   :  { %v1090_v21 = vpack.c.bf16 %v1138_v11, %v1138_v11  ;;  %v1086_v29 = vpack.c.bf16 %v1130_v12, %v1130_v12  ;;  %v426_v11 = vcombine.low %v380_v6, %v414_v7 }
  0xfc   :  { %v228_v13 = vpop.f32.mrf.mxu1  ;;  %v151_v16 = vpop.f32.mrf.mxu0 }
  0xfd   :  { %v1088_v14 = vpack.c.bf16 %v228_v13, %v228_v13  ;;  %v1084_v23 = vpack.c.bf16 %v151_v16, %v151_v16  ;;  %v532_v25 = vsel %vm110_vm0, %v1090_v21, 0  ;;  %v1067_v16 = vcombine.high %v380_v6, %v414_v7  ;;  %v1075_v7 = vld [vmem:[%s1560_s2 + $0x3] ss:$0 sm:$0xff]  ;;  %s1368_s2 = smov 32  }
  0xfe   :  { %v1139_v15 = vpop.f32.mrf.mxu1  ;;  %v1131_v20 = vpop.f32.mrf.mxu0 }
  0xff   :  { %v432_v17 = vsel %vm110_vm0, %v1088_v14, 0  ;;  %v1091_v26 = vpack.c.bf16 %v1139_v15, %v1139_v15  ;;  %v1087_v30 = vpack.c.bf16 %v1131_v20, %v1131_v20 }
 0x100   :  { %v231_v18 = vpop.f32.mrf.mxu1  ;;  %1149 = vmatpush3.bf16.xpose.msra.mxu1 %v432_v17  ;;  %v154_v24 = vpop.f32.mrf.mxu0  ;;  %v387_v17 = vrot.slane %v373_v9, %v1492_v5 }
 0x101   :  { %v1089_v19 = vpack.c.bf16 %v231_v18, %v231_v18  ;;  %1160 = vmatprep.subr.bf16.mxu1 %v1356_v8  ;;  %v1085_v27 = vpack.c.bf16 %v154_v24, %v154_v24  ;;  %v582_v28 = vsel %vm110_vm0, %v1091_v26, 0  ;;  %v421_v18 = vrot.slane %v407_v10, %v1492_v5 }
 0x102   :  { %v1146_v31 = vpop.f32.mrf.mxu0 }
 0x103   :  { %v482_v22 = vsel %vm110_vm0, %v1089_v19, 0  ;;  %v1094_v32 = vpack.c.bf16 %v1146_v31, %v1146_v31  ;;  %v526_v24 = vcombine.low %v387_v17, %v421_v18 }
 0x104   :  { %1155 = vmatpush3.bf16.xpose.msra.mxu0 %v482_v22  ;;  %v305_v33 = vpop.f32.mrf.mxu0 }
 0x105   :  { %1166 = vmatprep.subr.bf16.mxu0 %v1356_v8  ;;  %v1474_v34 = vsel %vm736_vm2, %v1094_v32, 0  ;;  %v1092_v35 = vpack.c.bf16 %v305_v33, %v305_v33  ;;  %v1070_v32 = vcombine.high %v387_v17, %v421_v18 }
 0x106   :  { %v1147_v36 = vpop.f32.mrf.mxu0 }
 0x107   :  { %1151 = vmatmul.mubr.msk.bf16.vlgmr.msra.gmra.mxu1 %vm110_vm0, %v1084_v23  ;;  %v738_v37 = vsel %vm736_vm2, %v1092_v35, 0  ;;  %v1095_v38 = vpack.c.bf16 %v1147_v36, %v1147_v36 }
 0x108   :  { %1161 = vmatpush3.bf16.xpose.msra.mxu1 %v532_v25  ;;  %1162 = vmatprep.mubr.msk.bf16.mxu1 %vm1357_vm1, %v1356_v8  ;;  %v308_v39 = vpop.f32.mrf.mxu0 }
 0x109   :  { %1172 = vmatprep.subr.bf16.mxu1 %v1356_v8  ;;  %v1476_v40 = vsel %vm736_vm2, %v1095_v38, 0  ;;  %v1093_v41 = vpack.c.bf16 %v308_v39, %v308_v39 }
 0x10b   :  { %1157 = vmatmul.mubr.msk.bf16.vlgmr.msra.gmra.mxu0 %vm110_vm0, %v1085_v27  ;;  %v784_v42 = vsel %vm736_vm2, %v1093_v41, 0  ;;  %vm1013_vm2 = vcmask 785408  }
 0x10c   :  { %1167 = vmatpush3.bf16.xpose.msra.mxu0 %v582_v28  ;;  %1168 = vmatprep.mubr.msk.bf16.mxu0 %vm1357_vm1, %v1356_v8 }
 0x10d   :  { %1178 = vmatprep.subr.bf16.mxu0 %v1356_v8 }
 0x10f   :  { %1163 = vmatmul.mubr.msk.bf16.vlgmr.msra.gmra.mxu1 %vm110_vm0, %v1086_v29 }
 0x110   :  { %1174 = vmatprep.mubr.msk.bf16.mxu1 %vm1357_vm1, %v1356_v8  ;;  %1173 = vmatpush3.bf16.msra.mxu1 %v738_v37 }
 0x111   :  { %1184 = vmatprep.subr.bf16.mxu1 %v1356_v8 }
 0x113   :  { %1169 = vmatmul.mubr.msk.bf16.vlgmr.msra.gmra.mxu0 %vm110_vm0, %v1087_v30 }
 0x114   :  { %1180 = vmatprep.mubr.msk.bf16.mxu0 %vm1357_vm1, %v1356_v8  ;;  %1179 = vmatpush3.bf16.msra.mxu0 %v784_v42 }
 0x115   :  { %1190 = vmatprep.subr.bf16.mxu0 %v1356_v8 }
 0x1c7   :  { %v468_v12 = vpop.f32.mrf.mxu1 }
 0x1c8   :  { %v469_v13 = vadd.f32 %v468_v12, %v426_v11  ;;  %v676_v12 = vand.u32 127, %v360_v48 }
 0x1c9   :  { %v1152_v14 = vpop.f32.mrf.mxu1 }
 0x1ca   :  { %v625_v15 = vsel %vm624_vm3, %v469_v13, -inf }
 0x1cb   :  { %626 = vmax.xlane.f32.xlu1 %v625_v15  ;;  %v471_v19 = vpop.f32.mrf.mxu1  ;;  %v518_v20 = vpop.f32.mrf.mxu0 }
 0x1cc   :  { %v519_v21 = vadd.f32 %v1067_v16, %v518_v20 }
 0x1cd   :  { %v1153_v22 = vpop.f32.mrf.mxu1  ;;  %v1158_v23 = vpop.f32.mrf.mxu0 }
 0x1ce   :  { %v628_v25 = vsel %vm624_vm3, %v519_v21, -inf }
 0x1cf   :  { %v568_v26 = vpop.f32.mrf.mxu1  ;;  %629 = vmax.xlane.f32.xlu0 %v628_v25  ;;  %v521_v27 = vpop.f32.mrf.mxu0 }
 0x1d0   :  { %v569_v28 = vadd.f32 %v568_v26, %v526_v24 }
 0x1d1   :  { %v1159_v29 = vpop.f32.mrf.mxu0  ;;  %v1164_v30 = vpop.f32.mrf.mxu1 }
 0x1d2   :  { %v631_v31 = vsel %vm624_vm3, %v569_v28, -inf }
 0x1d3   :  { %v571_v33 = vpop.f32.mrf.mxu1  ;;  %632 = vmax.xlane.f32.xlu0 %v631_v31  ;;  %v618_v35 = vpop.f32.mrf.mxu0 }
 0x1d4   :  { %v619_v36 = vadd.f32 %v1070_v32, %v618_v35 }
 0x1d5   :  { %v1165_v37 = vpop.f32.mrf.mxu1  ;;  %v1170_v38 = vpop.f32.mrf.mxu0 }
 0x1d6   :  { %v634_v39 = vsel %vm624_vm3, %v619_v36, -inf }
 0x1d7   :  { %635 = vmax.xlane.f32.xlu1 %v634_v39  ;;  %v621_v41 = vpop.f32.mrf.mxu0 }
 0x1d9   :  { %v1171_v42 = vpop.f32.mrf.mxu0 }
 0x254   :  { %v627_v44 = vpop.xlane.xlu1 %626 }
 0x255   :  { %v637_v45 = vsub.f32 %v469_v13, %v627_v44 }
 0x257   :  { %v641_v46 = vmul.f32 1.442695, %v637_v45 }
 0x258   :  { %v630_v47 = vpop.xlane.xlu0 %629 }
 0x259   :  { %1226 = vpow2.f32 %v641_v46  ;;  %v638_v49 = vsub.f32 %v519_v21, %v630_v47 }
 0x25b   :  { %v643_v50 = vmul.f32 1.442695, %v638_v49 }
 0x25c   :  { %v633_v51 = vpop.xlane.xlu0 %632 }
 0x25d   :  { %1228 = vpow2.f32 %v643_v50  ;;  %v639_v53 = vsub.f32 %v569_v28, %v633_v51 }
 0x25f   :  { %v645_v54 = vmul.f32 1.442695, %v639_v53 }
 0x260   :  { %v636_v1 = vpop.xlane.xlu1 %635 }
 0x261   :  { %1230 = vpow2.f32 %v645_v54  ;;  %v640_v2 = vsub.f32 %v619_v36, %v636_v1 }
 0x263   :  { %v647_v3 = vmul.f32 1.442695, %v640_v2 }
 0x265   :  { %1232 = vpow2.f32 %v647_v3 }
 0x266   :  { %v1227_v56 = vpop.eup %1226 }
 0x267   :  { %v649_v57 = vsel %vm624_vm3, %v1227_v56, 0.0 }
 0x268   :  { %650 = vadd.xlane.f32.xlu0 %v649_v57 }
 0x26a   :  { %v1229_v58 = vpop.eup %1228 }
 0x26b   :  { %v652_v59 = vsel %vm624_vm3, %v1229_v58, 0.0 }
 0x26c   :  { %653 = vadd.xlane.f32.xlu1 %v652_v59 }
 0x26e   :  { %v1231_v60 = vpop.eup %1230 }
 0x26f   :  { %v655_v61 = vsel %vm624_vm3, %v1231_v60, 0.0 }
 0x270   :  { %656 = vadd.xlane.f32.xlu0 %v655_v61 }
 0x272   :  { %v1233_v4 = vpop.eup %1232 }
 0x273   :  { %v658_v6 = vsel %vm624_vm3, %v1233_v4, 0.0 }
 0x27d   :  { %697 = vperm.xlu1 %1217, %v1073_v62  }
 0x281   :  { %700 = vperm.xlu1 %1217, %v1074_v63  }
 0x286   :  { %694 = vperm.xlu0 %1216, %v1072_v0  }
 0x2a5   :  { %659 = vadd.xlane.f32.xlu1 %v658_v6 }
 0x2b6   :  { %703 = vperm.xlu1 %1217, %v1075_v7  }
 0x2f1   :  { %v651_v9 = vpop.xlane.xlu0 %650 }
 0x2f2   :  { %1234 = vrcp.f32 %v651_v9 }
 0x2f5   :  { %v654_v10 = vpop.xlane.xlu1 %653 }
 0x2f6   :  { %1236 = vrcp.f32 %v654_v10 }
 0x2f9   :  { %v657_v11 = vpop.xlane.xlu0 %656  ;;  %v698_v13 = vpop.permute.xlu1 %697 }
 0x2fa   :  { %1238 = vrcp.f32 %v657_v11  ;;  %vm706_vm4 = vcmp.lt.s32.totalorder %v1481_v52, %v698_v13  ;;  %vm710_vm5 = vcmp.lt.s32.totalorder %v676_v12, %v698_v13 }
 0x2fb   :  { %vm714_vm6 = vmand %vm706_vm4, %vm710_vm5 }
 0x2fc   :  { %v1077_v20 = vsel %vm714_vm6, 1.0, %v1356_v8 }
 0x2fd   :  { %v701_v15 = vpop.permute.xlu1 %700 }
 0x2fe   :  { %vm707_vm10 = vcmp.lt.s32.totalorder %v1481_v52, %v701_v15  ;;  %vm711_vm11 = vcmp.lt.s32.totalorder %v676_v12, %v701_v15 }
 0x2ff   :  { %v1235_v14 = vpop.eup %1234  ;;  %vm715_vm12 = vmand %vm707_vm10, %vm711_vm11 }
 0x300   :  { %v665_v18 = vmul.f32 %v1235_v14, %v1227_v56  ;;  %v1078_v27 = vsel %vm715_vm12, 1.0, %v1356_v8 }
 0x301   :  { %v695_v16 = vpop.permute.xlu0 %694 }
 0x302   :  { %vm705_vm7 = vcmp.lt.s32.totalorder %v1481_v52, %v695_v16  ;;  %vm709_vm8 = vcmp.lt.s32.totalorder %v676_v12, %v695_v16 }
 0x303   :  { %v1237_v17 = vpop.eup %1236  ;;  %vm713_vm9 = vmand %vm705_vm7, %vm709_vm8 }
 0x304   :  { %v666_v19 = vmul.f32 %v1237_v17, %v1229_v58  ;;  %v1076_v48 = vsel %vm713_vm9, 1.0, %v1356_v8 }
 0x305   :  { %v725_v21 = vmul.f32 %v1076_v48, %v665_v18 }
 0x306   :  { %v726_v22 = vmul.f32 %v1077_v20, %v666_v19 }
 0x307   :  { %v1239_v23 = vpop.eup %1238  ;;  %v729_v24 = vpack.c.bf16 %v725_v21, %v725_v21 }
 0x308   :  { %v730_v25 = vpack.c.bf16 %v726_v22, %v726_v22  ;;  %v667_v26 = vmul.f32 %v1239_v23, %v1231_v60 }
 0x309   :  { %1175 = vmatmul.mubr.msk.bf16.vlgmr.msra.gmra.mxu1 %vm624_vm3, %v729_v24 }
 0x30a   :  { %1185 = vmatpush3.bf16.msra.mxu1 %v1474_v34  ;;  %1181 = vmatmul.mubr.msk.bf16.vlgmr.msra.gmra.mxu0 %vm624_vm3, %v730_v25  ;;  %v727_v28 = vmul.f32 %v1078_v27, %v667_v26 }
 0x30b   :  { %1191 = vmatpush3.bf16.msra.mxu0 %v1476_v40  ;;  %1186 = vmatprep.mubr.msk.bf16.mxu1 %vm1357_vm1, %v1356_v8 }
 0x30c   :  { %1192 = vmatprep.mubr.msk.bf16.mxu0 %vm1357_vm1, %v1356_v8  ;;  %v731_v29 = vpack.c.bf16 %v727_v28, %v727_v28  ;;  %vm1011_vm1 = vcmask 523264  }
 0x311   :  { %1187 = vmatmul.mubr.msk.bf16.vlgmr.msra.gmra.mxu1 %vm624_vm3, %v731_v29 }
 0x32e   :  { %v660_v30 = vpop.xlane.xlu1 %659 }
 0x32f   :  { %1240 = vrcp.f32 %v660_v30 }
 0x332   :  { %v704_v31 = vpop.permute.xlu1 %703 }
 0x333   :  { %vm708_vm13 = vcmp.lt.s32.totalorder %v1481_v52, %v704_v31  ;;  %vm712_vm14 = vcmp.lt.s32.totalorder %v676_v12, %v704_v31 }
 0x334   :  { %vm716_vm15 = vmand %vm708_vm13, %vm712_vm14 }
 0x335   :  { %v1079_v40 = vsel %vm716_vm15, 1.0, %v1356_v8 }
 0x33c   :  { %v1241_v34 = vpop.eup %1240 }
 0x33d   :  { %v668_v32 = vmul.f32 %v1241_v34, %v1233_v4 }
 0x33f   :  { %v728_v33 = vmul.f32 %v1079_v40, %v668_v32 }
 0x341   :  { %v732_v35 = vpack.c.bf16 %v728_v33, %v728_v33 }
 0x343   :  { %1193 = vmatmul.mubr.msk.bf16.vlgmr.msra.gmra.mxu0 %vm624_vm3, %v732_v35 }
 0x3c9   :  { %v774_v36 = vpop.f32.mrf.mxu1 }
 0x3ca   :  { %v820_v37 = vpop.f32.mrf.mxu0 }
 0x3cb   :  { %v1176_v38 = vpop.f32.mrf.mxu1 }
 0x3cc   :  { %v1182_v39 = vpop.f32.mrf.mxu0 }
 0x3cd   :  { %v777_v41 = vpop.f32.mrf.mxu1 }
 0x3ce   :  { %v823_v42 = vpop.f32.mrf.mxu0 }
 0x3cf   :  { %v1177_v43 = vpop.f32.mrf.mxu1 }
 0x3d0   :  { %v1183_v44 = vpop.f32.mrf.mxu0 }
 0x3d1   :  { %v866_v45 = vpop.f32.mrf.mxu1 }
 0x3d2   :  { %v918_v49 = vcombine.low %v774_v36, %v866_v45  ;;  %v919_v50 = vcombine.high %v774_v36, %v866_v45 }
 0x3d3   :  { %v1188_v52 = vpop.f32.mrf.mxu1 }
 0x3d4   :  { %v926_v57 = vrot.slane %v918_v49, %v1484_v55  ;;  %v933_v58 = vrot.slane %v919_v50, %v1484_v55 }
 0x3d5   :  { %v869_v46 = vpop.f32.mrf.mxu1 }
 0x3d7   :  { %v1189_v47 = vpop.f32.mrf.mxu1 }
 0x403   :  { %v912_v51 = vpop.f32.mrf.mxu0 }
 0x404   :  { %v934_v53 = vcombine.low %v820_v37, %v912_v51  ;;  %v935_v54 = vcombine.high %v820_v37, %v912_v51 }
 0x405   :  { %v1194_v56 = vpop.f32.mrf.mxu0 }
 0x406   :  { %v942_v59 = vrot.slane %v934_v53, %v1484_v55  ;;  %v949_v60 = vrot.slane %v935_v54, %v1484_v55 }
 0x407   :  { %v915_v61 = vpop.f32.mrf.mxu0 }
 0x408   :  { %v967_v62 = vcombine.high %v933_v58, %v949_v60  ;;  %v951_v63 = vcombine.high %v926_v57, %v942_v59  ;;  %v950_v1 = vcombine.low %v926_v57, %v942_v59  ;;  %v966_v6 = vcombine.low %v933_v58, %v949_v60 }
 0x409   :  { %v1195_v0 = vpop.f32.mrf.mxu0 }
 0x40a   :  { %v965_v2 = vrot.slane %v951_v63, %v1492_v5  ;;  %v981_v3 = vrot.slane %v967_v62, %v1492_v5  ;;  %v958_v7 = vrot.slane %v950_v1, %v1492_v5  ;;  %v974_v9 = vrot.slane %v966_v6, %v1492_v5 }
 0x40c   :  { %991 = vrot.lane.b32.xlu1 %v965_v2, %s1352_s26  ;;  %v985_v4 = vcombine.high %v981_v3, %v1356_v8  ;;  %v982_v55 = vcombine.high %v958_v7, %v1356_v8  ;;  %v984_v10 = vcombine.high %v974_v9, %v1356_v8  ;;  %v983_v11 = vcombine.high %v965_v2, %v1356_v8 }
 0x40e   :  { %1007 = vrot.lane.b32.xlu0 %v985_v4, %s1361_s20 }
 0x410   :  { %1003 = vrot.lane.b32.xlu1 %v981_v3, %s1352_s26  ;;  %s1369_s26 = smov [#allocation10]  }
 0x411   :  { %s1029_s8 = sshll.u32 %s1369_s26, 4  ;;  %s1030_s8 = int_to_ptr.vmem [resolvable:$true] %s1029_s8 }
 0x412   :  { %s1322_s9 = scalar_lea.vmem %s1030_s8, 128  ;;  %p1327_p7 = scmp.lt.s32.totalorder %s1030_s8, %s1030_s8 }
 0x413   :  { %p1323_p6 = scmp.ne.s32.totalorder %s1030_s8, %s1322_s9  ;;  %p1328_p8 = scmp.lt.s32.totalorder %s1322_s9, %s1322_s9 }
 0x414   :  { %987 = vrot.lane.b32.xlu1 %v982_v55, %s1368_s2 }
 0x415   :  { %p1329_p9 = por %p1328_p8, %p1327_p7 }
 0x417   :  { %p1330_p10 = pnand %p1329_p9, %p1323_p6 }
 0x418   :  { %999 = vrot.lane.b32.xlu1 %v984_v10, %s1368_s2 }
 0x41c   :  { %995 = vrot.lane.b32.xlu1 %v983_v11, %s1361_s20 }
 0x47e   :  { %v992_v12 = vpop.permute.xlu1 %991 }
 0x480   :  { %v1008_v5 = vpop.permute.xlu0 %1007 }
 0x482   :  { %v1004_v13 = vpop.permute.xlu1 %1003 }
 0x486   :  { %v988_v14 = vpop.permute.xlu1 %987 }
 0x487   :  { %v1010_v16 = vsel %vm110_vm0, %v958_v7, %v988_v14 }
 0x488   :  { %v1012_v19 = vsel %vm1011_vm1, %v1010_v16, %v992_v12 }
 0x48a   :  { %v1000_v15 = vpop.permute.xlu1 %999 }
 0x48b   :  { %v1015_v17 = vsel %vm110_vm0, %v974_v9, %v1000_v15 }
 0x48c   :  { %v1016_v18 = vsel %vm1011_vm1, %v1015_v17, %v1004_v13 }
 0x48d   :  { %v1017_v20 = vsel %vm1013_vm2, %v1016_v18, %v1008_v5 }
 0x48e   :  { %v996_v48 = vpop.permute.xlu1 %995 }
 0x48f   :  { %v1014_v8 = vsel %vm1013_vm2, %v1012_v19, %v996_v48 }
 0x490   :  { %v1020_v21 = vcombine.low %v1014_v8, %v1017_v20 }
 0x492   :  { %1022 = vst [vmem:[#allocation10] sm:$0xff] %v1020_v21 }
 0x493   :  { %1333 = shalt.err (!%p1330_p10)
}
 0x494   :  { %1032 = dma.vmem_to_hbm [thread:$0]  %s1030_s8, 128, %s1564_s6, [#allocation4]  }
 0x495   :  { %1348 = dma.done.wait [#allocation4], 128  }
 0x496   :  { %1349 = vsyncadd [#allocation4], 4294967168 }
 0x497   :  { %1036 = vsyncpa [#allocation3], 1 }
 0x498   :  { %1037 = vsyncpa [#allocation6], 1 }
 0x499   :  { %1038 = vsyncpa [#allocation9], 1 }
 0x49a   :  { %1039 = vsyncpa [#allocation4], 1 }

</bundles_post_ra>
